<compile_context>
chip_gen: v6e
topology: v6e:2x2x1
jax: 0.10.0
libtpu: 0.0.40
codegen_flags: <defaults>
</compile_context>

<pallas_src>
import jax
import jax.numpy as jnp
from jax.experimental import pallas as pl
from jax.experimental.pallas import tpu as pltpu

HIDDEN = 256  # matches nn.Linear(input_dim, 256) in the PyTorch module


def _round_up(x, m):
    return (x + m - 1) // m * m


def two_head_kernel(x_ref, w1_ref, w2_ref, b_ref, out_ref):
    h_width = w1_ref.shape[1]                  # 2 * HIDDEN (static)
    x = x_ref[...].astype(jnp.bfloat16)

    # Fused layer 1 (both heads): (TB, in) @ (in, 2H) -> f32 accumulate on MXU.
    h = jnp.dot(x, w1_ref[...], preferred_element_type=jnp.float32)
    h = jnp.maximum(h + b_ref[:, :h_width], 0.0)

    # Fused block-diagonal layer 2: (TB, 2H) @ (2H, Npad) -> (TB, Npad).
    out = jnp.dot(h.astype(jnp.bfloat16), w2_ref[...],
                  preferred_element_type=jnp.float32)
    out_ref[...] = (out + b_ref[:, h_width:]).astype(out_ref.dtype)


def two_head_forward(state, packed_params, output_dim):
    """state: (B, input_dim) f32. Returns (logits (B, output_dim), value (B, 1))."""
    w1, w2, b = packed_params
    B, in_dim = state.shape
    n_out_pad = w2.shape[1]

    tb = 512 if B >= 512 else _round_up(B, 8)
    b_pad = _round_up(B, tb)
    if b_pad != B:
        state = jnp.pad(state, ((0, b_pad - B), (0, 0)))

    flops = 2 * b_pad * (in_dim * 2 * HIDDEN + 2 * HIDDEN * n_out_pad)
    bytes_accessed = (state.size * state.dtype.itemsize
                      + w1.size * w1.dtype.itemsize
                      + w2.size * w2.dtype.itemsize
                      + b.size * b.dtype.itemsize
                      + b_pad * n_out_pad * 4)

    out = pl.pallas_call(
        two_head_kernel,
        out_shape=jax.ShapeDtypeStruct((b_pad, n_out_pad), jnp.float32),
        grid_spec=pltpu.PrefetchScalarGridSpec(
            num_scalar_prefetch=0,
            grid=(b_pad // tb,),
            in_specs=[
                pl.BlockSpec((tb, in_dim), lambda i: (i, 0)),            # streamed acts
                pl.BlockSpec((in_dim, 2 * HIDDEN), lambda i: (0, 0)),    # W1, resident
                pl.BlockSpec((2 * HIDDEN, n_out_pad), lambda i: (0, 0)), # W2, resident
                pl.BlockSpec((1, 2 * HIDDEN + n_out_pad), lambda i: (0, 0)),  # biases
            ],
            out_specs=pl.BlockSpec((tb, n_out_pad), lambda i: (i, 0)),
        ),
        compiler_params=pltpu.CompilerParams(dimension_semantics=("parallel",)),
        cost_estimate=pl.CostEstimate(flops=flops, transcendentals=0,
                                      bytes_accessed=bytes_accessed),
    )(state, w1, w2, b)

    logits = out[:B, :output_dim]
    value = out[:B, output_dim:output_dim + 1]
    return logits, value


def init_params(key, input_dim, output_dim, hidden=HIDDEN):
    """Deterministic init mimicking nn.Linear's U(-1/sqrt(fan_in), 1/sqrt(fan_in)).

    Weights are (in_features, out_features) — transposed relative to PyTorch storage.
    Biases are (1, out_features). All f32 (the 'module' parameters).
    """
    def linear(k, fan_in, fan_out):
        kw, kb = jax.random.split(k)
        bound = 1.0 / jnp.sqrt(fan_in)
        w = jax.random.uniform(kw, (fan_in, fan_out), jnp.float32, -bound, bound)
        b = jax.random.uniform(kb, (1, fan_out), jnp.float32, -bound, bound)
        return w, b

    k1, k2, k3, k4 = jax.random.split(key, 4)
    wp1, bp1 = linear(k1, input_dim, hidden)     # policy1
    wp2, bp2 = linear(k2, hidden, output_dim)    # policy2
    wv1, bv1 = linear(k3, input_dim, hidden)     # value1
    wv2, bv2 = linear(k4, hidden, 1)             # value2
    return (wp1, bp1, wp2, bp2, wv1, bv1, wv2, bv2)


def pack_params(params, output_dim):
    """Pack the 8 module parameters into 3 HBM arrays consumed by the kernel."""
    wp1, bp1, wp2, bp2, wv1, bv1, wv2, bv2 = params
    hidden = wp1.shape[1]
    n_out_pad = max(128, _round_up(output_dim + 1, 128))   # lane-dense fused width

    # Layer 1: concatenate both heads along the output-feature axis.
    w1 = jnp.concatenate([wp1, wv1], axis=1).astype(jnp.bfloat16)   # (in, 2H)
    b1 = jnp.concatenate([bp1, bv1], axis=1)                         # (1, 2H) f32

    # Layer 2: block-diagonal [Wp2 0; 0 Wv2], zero-padded to n_out_pad lanes.
    w2 = jnp.zeros((2 * hidden, n_out_pad), jnp.float32)
    w2 = w2.at[:hidden, :output_dim].set(wp2)
    w2 = w2.at[hidden:, output_dim:output_dim + 1].set(wv2)
    w2 = w2.astype(jnp.bfloat16)                                     # (2H, Npad)

    b2 = jnp.zeros((1, n_out_pad), jnp.float32)
    b2 = b2.at[:, :output_dim].set(bp2)
    b2 = b2.at[:, output_dim:output_dim + 1].set(bv2)

    b = jnp.concatenate([b1, b2], axis=1)                            # (1, 2H + Npad) f32
    return (w1, w2, b)


def reference_forward(state, params):
    """Plain-JAX f32 reference of the PyTorch forward for correctness checking."""
    wp1, bp1, wp2, bp2, wv1, bv1, wv2, bv2 = params
    logits = jnp.maximum(state @ wp1 + bp1, 0.0) @ wp2 + bp2
    value = jnp.maximum(state @ wv1 + bv1, 0.0) @ wv2 + bv2
    return logits, value


if __name__ == "__main__":
    key = jax.random.PRNGKey(0)
    k_params, k_state, k_state2 = jax.random.split(key, 3)

    B, input_dim, output_dim = 8, 32, 4
    params = init_params(k_params, input_dim, output_dim)
    packed = pack_params(params, output_dim)

    # Small-batch run (single grid step).
    state = jax.random.normal(k_state, (B, input_dim), jnp.float32)
    logits, value = two_head_forward(state, packed, output_dim)
    jax.block_until_ready((logits, value))

    ref_logits, ref_value = reference_forward(state, params)
    assert logits.shape == (B, output_dim) and value.shape == (B, 1)
    # bf16 weight storage (f32 accumulation) -> loosened tolerance vs f32 reference.
    assert jnp.allclose(logits, ref_logits, atol=2e-2, rtol=5e-2)
    assert jnp.allclose(value, ref_value, atol=2e-2, rtol=5e-2)

    # Larger batch exercising the batch grid (2 tiles of 512) + padding path.
    B2 = 600
    state2 = jax.random.normal(k_state2, (B2, input_dim), jnp.float32)
    logits2, value2 = two_head_forward(state2, packed, output_dim)
    jax.block_until_ready((logits2, value2))
    ref_logits2, ref_value2 = reference_forward(state2, params)
    assert logits2.shape == (B2, output_dim) and value2.shape == (B2, 1)
    assert jnp.allclose(logits2, ref_logits2, atol=2e-2, rtol=5e-2)
    assert jnp.allclose(value2, ref_value2, atol=2e-2, rtol=5e-2)

    print("KERNEL_OK")
</pallas_src>

<mosaic_0001>
module attributes {stable_mosaic.version = 11 : i64} {
  func.func @two_head_kernel(%arg0: i32, %arg1: memref<8x32xf32, #tpu.memory_space<vmem>>, %arg2: memref<32x512xbf16, #tpu.memory_space<vmem>>, %arg3: memref<512x128xbf16, #tpu.memory_space<vmem>>, %arg4: memref<1x640xf32, #tpu.memory_space<vmem>>, %arg5: memref<8x128xf32, #tpu.memory_space<vmem>>) attributes {dimension_semantics = [#tpu.dimension_semantics<parallel>], iteration_bounds = array<i64: 1>, scalar_prefetch = 0 : i64, scratch_operands = 0 : i64, tpu.core_type = #tpu.core_type<tc>, window_params = [{transform_indices = @transform_0, window_bounds = array<i64: 8, 32>}, {pipeline_mode = #tpu.pipeline_mode<synchronous>, transform_indices = @transform_1, window_bounds = array<i64: 32, 512>}, {pipeline_mode = #tpu.pipeline_mode<synchronous>, transform_indices = @transform_2, window_bounds = array<i64: 512, 128>}, {pipeline_mode = #tpu.pipeline_mode<synchronous>, transform_indices = @transform_3, window_bounds = array<i64: 1, 640>}, {transform_indices = @transform_4, window_bounds = array<i64: 8, 128>}]} {
    %c0 = arith.constant 0 : index
    %c0_0 = arith.constant 0 : index
    %0 = vector.load %arg1[%c0, %c0_0] : memref<8x32xf32, #tpu.memory_space<vmem>>, vector<8x32xf32>
    %1 = arith.truncf %0 : vector<8x32xf32> to vector<8x32xbf16>
    %c0_1 = arith.constant 0 : index
    %c0_2 = arith.constant 0 : index
    %2 = vector.load %arg2[%c0_1, %c0_2] : memref<32x512xbf16, #tpu.memory_space<vmem>>, vector<32x512xbf16>
    %cst = arith.constant dense<0.000000e+00> : vector<8x512xf32>
    %3 = tpu.matmul %1, %2, %cst {dimension_numbers = #tpu.dot_dimension_numbers<[1], [0], [0], [1], [0, 0, 1, 1], [], []>} : vector<8x32xbf16>, vector<32x512xbf16>, vector<8x512xf32> -> vector<8x512xf32>
    %c0_3 = arith.constant 0 : index
    %c0_4 = arith.constant 0 : index
    %4 = vector.load %arg4[%c0_3, %c0_4] : memref<1x640xf32, #tpu.memory_space<vmem>>, vector<1x512xf32>
    %5 = vector.broadcast %4 : vector<1x512xf32> to vector<8x512xf32>
    %6 = arith.addf %3, %5 : vector<8x512xf32>
    %cst_5 = arith.constant 0.000000e+00 : f32
    %7 = vector.broadcast %cst_5 : f32 to vector<8x512xf32>
    %8 = arith.maximumf %6, %7 : vector<8x512xf32>
    %9 = arith.truncf %8 : vector<8x512xf32> to vector<8x512xbf16>
    %c0_6 = arith.constant 0 : index
    %c0_7 = arith.constant 0 : index
    %10 = vector.load %arg3[%c0_6, %c0_7] : memref<512x128xbf16, #tpu.memory_space<vmem>>, vector<512x128xbf16>
    %cst_8 = arith.constant dense<0.000000e+00> : vector<8x128xf32>
    %11 = tpu.matmul %9, %10, %cst_8 {dimension_numbers = #tpu.dot_dimension_numbers<[1], [0], [0], [1], [0, 0, 1, 1], [], []>} : vector<8x512xbf16>, vector<512x128xbf16>, vector<8x128xf32> -> vector<8x128xf32>
    %c0_9 = arith.constant 0 : index
    %c512 = arith.constant 512 : index
    %12 = vector.load %arg4[%c0_9, %c512] : memref<1x640xf32, #tpu.memory_space<vmem>>, vector<1x128xf32>
    %13 = vector.broadcast %12 : vector<1x128xf32> to vector<8x128xf32>
    %14 = arith.addf %11, %13 : vector<8x128xf32>
    %c0_10 = arith.constant 0 : index
    %c0_11 = arith.constant 0 : index
    %15 = vector.load %arg5[%c0_10, %c0_11] : memref<8x128xf32, #tpu.memory_space<vmem>>, vector<8x128xf32>
    tpu.vector_store %arg5[%c0_10, %c0_11], %14 {strides = array<i32>} : memref<8x128xf32, #tpu.memory_space<vmem>>, vector<8x128xf32>,
    return
  }
  func.func @transform_0(%arg0: i32) -> (i32, i32) {
    %c0_i32 = arith.constant 0 : i32
    %c0_i32_0 = arith.constant 0 : i32
    return %arg0, %c0_i32 : i32, i32
  }
  func.func @transform_1(%arg0: i32) -> (i32, i32) {
    %c0_i32 = arith.constant 0 : i32
    %c0_i32_0 = arith.constant 0 : i32
    %c0_i32_1 = arith.constant 0 : i32
    return %c0_i32, %c0_i32_0 : i32, i32
  }
  func.func @transform_2(%arg0: i32) -> (i32, i32) {
    %c0_i32 = arith.constant 0 : i32
    %c0_i32_0 = arith.constant 0 : i32
    %c0_i32_1 = arith.constant 0 : i32
    return %c0_i32, %c0_i32_0 : i32, i32
  }
  func.func @transform_3(%arg0: i32) -> (i32, i32) {
    %c0_i32 = arith.constant 0 : i32
    %c0_i32_0 = arith.constant 0 : i32
    %c0_i32_1 = arith.constant 0 : i32
    return %c0_i32, %c0_i32_0 : i32, i32
  }
  func.func @transform_4(%arg0: i32) -> (i32, i32) {
    %c0_i32 = arith.constant 0 : i32
    %c0_i32_0 = arith.constant 0 : i32
    return %arg0, %c0_i32 : i32, i32
  }
}

</mosaic_0001>

<bundles_post_ra>
// kernel: tpu_custom_call.1
= control target key start
LH: loop header
LB: loop body
LE: loop exit
PB: predicated region body
PF: predicated region fallthrough
CT: control target
= control target key end

     0   :  { %9 = vsyncpa [#allocation3], 0  ;;  %s862_s0 = inlined_call_operand.hbm [shape: f32[8,32], index: 0, kind: input, shape index: {}]   ;;  %s863_s1 = inlined_call_operand.hbm [shape: bf16[32,512], index: 1, kind: input, shape index: {}]   ;;  %s864_s2 = inlined_call_operand.hbm [shape: bf16[512,128], index: 2, kind: input, shape index: {}]   ;;  %s865_s3 = inlined_call_operand.vmem [shape: f32[1,640], index: 3, kind: input, shape index: {}]   ;;  %s866_s4 = inlined_call_operand.hbm [shape: f32[8,128], index: 4, kind: output, shape index: {}]  }
   0x1   :  { %10 = vsyncpa [#allocation6], 0 }
   0x2   :  { %11 = vsyncpa [#allocation4], 0  ;;  %s810_s15 = smov [#allocation5]  }
   0x3   :  { %s27_s16 = sshll.u32 %s810_s15, 4  ;;  %s28_s16 = int_to_ptr.vmem [resolvable:$true] %s27_s16 }
   0x4   :  { %s732_s17 = scalar_lea.vmem %s28_s16, 1024  ;;  %p737_p1 = scmp.lt.s32.totalorder %s28_s16, %s28_s16 }
   0x5   :  { %p733_p0 = scmp.ne.s32.totalorder %s28_s16, %s732_s17  ;;  %p738_p2 = scmp.lt.s32.totalorder %s732_s17, %s732_s17 }
   0x7   :  { %p739_p3 = por %p738_p2, %p737_p1 }
   0x9   :  { %p740_p4 = pnand %p739_p3, %p733_p0 }
   0xb   :  { %743 = shalt.err (!%p740_p4)
}
   0xc   :  { %s811_s18 = smov 256   ;;  %s812_s19 = smov 16  }
   0xd   :  { %33 = dma.hbm_to_vmem [thread:$0]  %s863_s1, 1024, %s28_s16, [#allocation6], %s811_s18, %s811_s18, %s812_s19  }
   0xe   :  { %s813_s22 = smov [#allocation2]   ;;  %s814_s24 = smov [#allocation7]  }
   0xf   :  { %s18_s23 = sshll.u32 %s813_s22, 4  ;;  %s39_s25 = sshll.u32 %s814_s24, 4  ;;  %s19_s23 = int_to_ptr.vmem [resolvable:$true] %s18_s23  ;;  %s40_s25 = int_to_ptr.vmem [resolvable:$true] %s39_s25 }
  0x10   :  { %s752_s26 = scalar_lea.vmem %s19_s23, 128  ;;  %p757_p6 = scmp.lt.s32.totalorder %s19_s23, %s19_s23 }
  0x11   :  { %p753_p5 = scmp.ne.s32.totalorder %s19_s23, %s752_s26  ;;  %p758_p7 = scmp.lt.s32.totalorder %s752_s26, %s752_s26 }
  0x13   :  { %p759_p8 = por %p758_p7, %p757_p6 }
  0x15   :  { %p760_p9 = pnand %p759_p8, %p753_p5 }
  0x17   :  { %763 = shalt.err (!%p760_p9)
}
  0x18   :  { %21 = dma.hbm_to_vmem [thread:$0]  %s862_s0, 128, %s19_s23, [#allocation3]  }
  0x19   :  { %s772_s29 = scalar_lea.vmem %s40_s25, 4096  ;;  %p777_p11 = scmp.lt.s32.totalorder %s40_s25, %s40_s25 }
  0x1a   :  { %p773_p10 = scmp.ne.s32.totalorder %s40_s25, %s772_s29  ;;  %p778_p12 = scmp.lt.s32.totalorder %s772_s29, %s772_s29 }
  0x1c   :  { %p779_p13 = por %p778_p12, %p777_p11 }
  0x1e   :  { %p780_p0 = pnand %p779_p13, %p773_p10 }
  0x20   :  { %783 = shalt.err (!%p780_p0)
}
  0x21   :  { %s815_s1 = smov 64   ;;  %s816_s30 = smov 4  }
  0x22   :  { %45 = dma.hbm_to_vmem [thread:$0]  %s864_s2, 4096, %s40_s25, [#allocation6], %s815_s1, %s815_s1, %s816_s30  }
  0x23   :  { %804 = dma.done.wait [#allocation3], 128  }
  0x24   :  { %805 = vsyncadd [#allocation3], 4294967168 }
  0x25   :  { %806 = dma.done.wait [#allocation6], 5120  }
  0x26   :  { %807 = vsyncadd [#allocation6], 4294962176  ;;  %v817_v0 = vmov 0   ;;  %v680_v1 = vld [vmem:[#allocation5 + $0x24] ss:$16 sps:$4 sm:$0xff]   ;;  %v58_v9 = vld [vmem:[#allocation2] sm:$0xff]  ;;  %v70_v43 = vlaneseq }
  0x27   :  { %166 = vmatprep.mubr.bf16.mxu0 %v817_v0  ;;  %207 = vmatprep.mubr.bf16.mxu1 %v817_v0  ;;  %v682_v2 = vld [vmem:[#allocation5 + $0x2c] ss:$16 sps:$4 sm:$0xff]   ;;  %v684_v3 = vld [vmem:[#allocation5 + $0x20] ss:$16 sps:$4 sm:$0xff]   ;;  %v685_v4 = vld [vmem:[#allocation5 + $0x28] ss:$16 sps:$4 sm:$0xff]   ;;  %v59_v11 = vpack.c.bf16 %v58_v9, %v58_v9 }
  0x28   :  { %146 = vmatprep.subr.bf16.mxu0 %v680_v1  ;;  %187 = vmatprep.subr.bf16.mxu1 %v682_v2  ;;  %v686_v5 = vld [vmem:[#allocation5 + $0x4] ss:$16 sps:$4 sm:$0xff]   ;;  %v688_v6 = vld [vmem:[#allocation5 + $0xc] ss:$16 sps:$4 sm:$0xff]   ;;  %v690_v7 = vld [vmem:[#allocation5] ss:$16 sps:$4 sm:$0xff]  }
  0x29   :  { %147 = vmatpush1.bf16.msra.mxu0 %v684_v3  ;;  %188 = vmatpush1.bf16.msra.mxu1 %v685_v4  ;;  %v691_v8 = vld [vmem:[#allocation5 + $0x8] ss:$16 sps:$4 sm:$0xff]   ;;  %vm130_vm0 = vcmask 261120   ;;  %v696_v15 = vld [vmem:[#allocation7 + $0x70] sm:$0xff]   ;;  %v704_v23 = vld [vmem:[#allocation7 + $0x60] sm:$0xff]   ;;  %v71_v44 = vshrl.u32 %v70_v43, 7 }
  0x2a   :  { %148 = vmatprep.subr.bf16.mxu0 %v686_v5  ;;  %189 = vmatprep.subr.bf16.mxu1 %v688_v6  ;;  %v692_v10 = vld [vmem:[#allocation7 + $0x78] sm:$0xff]   ;;  %v697_v16 = vld [vmem:[#allocation7 + $0xf0] sm:$0xff]   ;;  %v700_v19 = vld [vmem:[#allocation7 + $0x68] sm:$0xff]   ;;  %s818_s9 = smov [#allocation8]  }
  0x2b   :  { %v693_v12 = vld [vmem:[#allocation7 + $0xf8] sm:$0xff]   ;;  %v698_v17 = vld [vmem:[#allocation7 + $0x30] sm:$0xff]   ;;  %v701_v20 = vld [vmem:[#allocation7 + $0xe8] sm:$0xff]   ;;  %v72_v45 = vsub.s32 0, %v71_v44  ;;  %v80_v46 = vsub.s32 2, %v71_v44  ;;  %v76_v48 = vsub.s32 1, %v71_v44 }
  0x2c   :  { %v694_v13 = vld [vmem:[#allocation7 + $0x38] sm:$0xff]   ;;  %v699_v18 = vld [vmem:[#allocation7 + $0xb0] sm:$0xff]   ;;  %v702_v21 = vld [vmem:[#allocation7 + $0x28] sm:$0xff]   ;;  %v84_v49 = vsub.s32 3, %v71_v44  ;;  %s574_s10 = sshll.u32 %s818_s9, 4  ;;  %s575_s10 = int_to_ptr.vmem [resolvable:$true] %s574_s10 }
  0x2d   :  { %149 = vmatpush1.bf16.msra.mxu0 %v690_v7  ;;  %190 = vmatpush1.bf16.msra.mxu1 %v691_v8  ;;  %v695_v14 = vld [vmem:[#allocation7 + $0xb8] sm:$0xff]   ;;  %v703_v22 = vld [vmem:[#allocation7 + $0xa8] sm:$0xff]   ;;  %v705_v24 = vld [vmem:[#allocation7 + $0xe0] sm:$0xff]   ;;  %s784_s11 = scalar_lea.vmem %s575_s10, 128  ;;  %p789_p2 = scmp.lt.s32.totalorder %s575_s10, %s575_s10 }
  0x2e   :  { %627 = vmatprep.subr.bf16.mxu0 %v692_v10  ;;  %649 = vmatprep.subr.bf16.mxu1 %v693_v12  ;;  %v706_v25 = vld [vmem:[#allocation7 + $0x20] sm:$0xff]   ;;  %v708_v27 = vld [vmem:[#allocation7 + $0x58] sm:$0xff]   ;;  %v712_v31 = vld [vmem:[#allocation7 + $0x50] sm:$0xff]   ;;  %p785_p1 = scmp.ne.s32.totalorder %s575_s10, %s784_s11  ;;  %p790_p3 = scmp.lt.s32.totalorder %s784_s11, %s784_s11 }
  0x2f   :  { %v707_v26 = vld [vmem:[#allocation7 + $0xa0] sm:$0xff]   ;;  %v709_v28 = vld [vmem:[#allocation7 + $0xd8] sm:$0xff]   ;;  %v713_v32 = vld [vmem:[#allocation7 + $0xd0] sm:$0xff]  }
  0x30   :  { %592 = vmatmul.mubr.msk.bf16.vlgmr.msra.gmra.mxu0 %vm130_vm0, %v59_v11  ;;  %593 = vmatmul.mubr.msk.bf16.vlgmr.msra.gmra.mxu1 %vm130_vm0, %v59_v11  ;;  %v710_v29 = vld [vmem:[#allocation7 + $0x18] sm:$0xff]   ;;  %v714_v33 = vld [vmem:[#allocation7 + $0x10] sm:$0xff]   ;;  %v716_v35 = vld [vmem:[#allocation7 + $0x48] sm:$0xff]   ;;  %p791_p4 = por %p790_p3, %p789_p2 }
  0x31   :  { %628 = vmatpush3.bf16.msra.mxu0 %v694_v13  ;;  %650 = vmatpush3.bf16.msra.mxu1 %v695_v14  ;;  %v711_v30 = vld [vmem:[#allocation7 + $0x98] sm:$0xff]   ;;  %v715_v34 = vld [vmem:[#allocation7 + $0x90] sm:$0xff]   ;;  %v717_v36 = vld [vmem:[#allocation7 + $0xc8] sm:$0xff]  }
  0x32   :  { %629 = vmatprep.subr.bf16.mxu0 %v696_v15  ;;  %651 = vmatprep.subr.bf16.mxu1 %v697_v16  ;;  %v718_v37 = vld [vmem:[#allocation7 + $0x8] sm:$0xff]   ;;  %v720_v39 = vld [vmem:[#allocation7 + $0x40] sm:$0xff]   ;;  %v68_v47 = vld [vmem:[%s865_s3] sm:$0xf]  ;;  %p792_p5 = pnand %p791_p4, %p785_p1 }
  0x33   :  { %v719_v38 = vld [vmem:[#allocation7 + $0x88] sm:$0xff]   ;;  %v721_v40 = vld [vmem:[#allocation7 + $0xc0] sm:$0xff]   ;;  %v73_v50 = vrot.slane %v68_v47, %v72_v45  ;;  %v81_v51 = vrot.slane %v68_v47, %v80_v46  ;;  %v77_v52 = vrot.slane %v68_v47, %v76_v48  ;;  %v85_v53 = vrot.slane %v68_v47, %v84_v49  ;;  %v594_v12 = vld [vmem:[%s865_s3 + $0x4] ss:$0 sm:$0xff] }
  0x34   :  { %v722_v41 = vld [vmem:[#allocation7] sm:$0xff]  }
  0x35   :  { %630 = vmatpush3.bf16.msra.mxu0 %v698_v17  ;;  %652 = vmatpush3.bf16.msra.mxu1 %v699_v18  ;;  %v723_v42 = vld [vmem:[#allocation7 + $0x80] sm:$0xff]  }
  0x36   :  { %631 = vmatprep.subr.bf16.mxu0 %v700_v19  ;;  %653 = vmatprep.subr.bf16.mxu1 %v701_v20 }
  0x39   :  { %632 = vmatpush3.bf16.msra.mxu0 %v702_v21  ;;  %654 = vmatpush3.bf16.msra.mxu1 %v703_v22 }
  0x3a   :  { %633 = vmatprep.subr.bf16.mxu0 %v704_v23  ;;  %655 = vmatprep.subr.bf16.mxu1 %v705_v24 }
  0x3d   :  { %634 = vmatpush3.bf16.msra.mxu0 %v706_v25  ;;  %656 = vmatpush3.bf16.msra.mxu1 %v707_v26 }
  0x3e   :  { %635 = vmatprep.subr.bf16.mxu0 %v708_v27  ;;  %657 = vmatprep.subr.bf16.mxu1 %v709_v28 }
  0x41   :  { %636 = vmatpush3.bf16.msra.mxu0 %v710_v29  ;;  %658 = vmatpush3.bf16.msra.mxu1 %v711_v30 }
  0x42   :  { %637 = vmatprep.subr.bf16.mxu0 %v712_v31  ;;  %659 = vmatprep.subr.bf16.mxu1 %v713_v32 }
  0x45   :  { %638 = vmatpush3.bf16.msra.mxu0 %v714_v33  ;;  %660 = vmatpush3.bf16.msra.mxu1 %v715_v34 }
  0x46   :  { %639 = vmatprep.subr.bf16.mxu0 %v716_v35  ;;  %661 = vmatprep.subr.bf16.mxu1 %v717_v36 }
  0x49   :  { %640 = vmatpush3.bf16.msra.mxu0 %v718_v37  ;;  %662 = vmatpush3.bf16.msra.mxu1 %v719_v38 }
  0x4a   :  { %641 = vmatprep.subr.bf16.mxu0 %v720_v39  ;;  %663 = vmatprep.subr.bf16.mxu1 %v721_v40 }
  0x4d   :  { %642 = vmatpush3.bf16.msra.mxu0 %v722_v41  ;;  %664 = vmatpush3.bf16.msra.mxu1 %v723_v42 }
  0xf0   :  { %v168_v54 = vpop.f32.mrf.mxu0  ;;  %v209_v55 = vpop.f32.mrf.mxu1 }
  0xf1   :  { %v169_v56 = vadd.f32 %v168_v54, %v73_v50  ;;  %v210_v57 = vadd.f32 %v209_v55, %v81_v51 }
  0xf2   :  { %v170_v58 = vpop.f32.mrf.mxu0  ;;  %v211_v59 = vpop.f32.mrf.mxu1 }
  0xf3   :  { %v218_v60 = vmax.f32 %v210_v57, 0.0  ;;  %v171_v61 = vadd.f32 %v170_v58, %v77_v52  ;;  %v212_v62 = vadd.f32 %v211_v59, %v85_v53  ;;  %v216_v63 = vmax.f32 %v169_v56, 0.0 }
  0xf4   :  { %v172_v0 = vpop.f32.mrf.mxu0  ;;  %v213_v1 = vpop.f32.mrf.mxu1 }
  0xf5   :  { %v217_v2 = vmax.f32 %v171_v61, 0.0  ;;  %v219_v3 = vmax.f32 %v212_v62, 0.0  ;;  %v222_v4 = vpack.c.bf16 %v218_v60, %v218_v60  ;;  %v220_v9 = vpack.c.bf16 %v216_v63, %v216_v63 }
  0xf6   :  { %v173_v5 = vpop.f32.mrf.mxu0  ;;  %v214_v6 = vpop.f32.mrf.mxu1 }
  0xf7   :  { %v221_v7 = vpack.c.bf16 %v217_v2, %v217_v2  ;;  %v223_v8 = vpack.c.bf16 %v219_v3, %v219_v3 }
  0xf9   :  { %519 = vmatprep.mubr.bf16.mxu0 %v221_v7  ;;  %559 = vmatprep.mubr.bf16.mxu1 %v223_v8 }
  0xfa   :  { %520 = vmatmul.mubr.bf16.vlgmr.msra.gmra.mxu0 %v220_v9  ;;  %560 = vmatmul.mubr.bf16.vlgmr.msra.gmra.mxu1 %v222_v4 }
 0x1ba   :  { %v643_v10 = vpop.f32.mrf.mxu0  ;;  %v665_v11 = vpop.f32.mrf.mxu1 }
 0x1bc   :  { %v644_v13 = vpop.f32.mrf.mxu0  ;;  %v666_v14 = vpop.f32.mrf.mxu1 }
 0x1bd   :  { %v645_v15 = vadd.f32 %v644_v13, %v643_v10  ;;  %v667_v19 = vadd.f32 %v666_v14, %v665_v11 }
 0x1be   :  { %v646_v16 = vpop.f32.mrf.mxu0  ;;  %v668_v17 = vpop.f32.mrf.mxu1 }
 0x1bf   :  { %v522_v18 = vadd.f32 %v645_v15, %v594_v12 }
 0x1c0   :  { %v647_v20 = vpop.f32.mrf.mxu0  ;;  %v669_v21 = vpop.f32.mrf.mxu1 }
 0x1c1   :  { %v562_v22 = vadd.f32 %v667_v19, %v522_v18 }
 0x1c3   :  { %567 = vst [vmem:[#allocation8] sm:$0xff] %v562_v22 }
 0x1c4   :  { %795 = shalt.err (!%p792_p5)
}
 0x1c5   :  { %577 = dma.vmem_to_hbm [thread:$0]  %s575_s10, 128, %s866_s4, [#allocation4]  }
 0x1c6   :  { %808 = dma.done.wait [#allocation4], 128  }
 0x1c7   :  { %809 = vsyncadd [#allocation4], 4294967168 }
 0x1c8   :  { %581 = vsyncpa [#allocation3], 1 }
 0x1c9   :  { %582 = vsyncpa [#allocation6], 1 }
 0x1ca   :  { %583 = vsyncpa [#allocation4], 1 }

</bundles_post_ra>
